<compile_context>
chip_gen: v6e
topology: v6e:2x2x1
jax: 0.10.0
libtpu: 0.0.40
codegen_flags: <defaults>
</compile_context>

<pallas_src>
import jax
import jax.numpy as jnp
from jax.experimental import pallas as pl
from jax.experimental.pallas import tpu as pltpu


def _dual_1x1_relu_kernel(wa_ref, ba_ref, wb_ref, bb_ref,
                          x1_ref, x2_ref, oa_ref, ob_ref):
    """One grid step: 1x1 conv + bias + ReLU for both submodels on one tile.

    wa_ref/wb_ref : VMEM (Cout, Cin) f32   -- transposed 1x1-conv weights
    ba_ref/bb_ref : VMEM (Cout, 1)   f32   -- biases (lane-broadcast)
    x1_ref/x2_ref : VMEM (Cin,  T)   f32   -- input slabs, T on the lane axis
    oa_ref/ob_ref : VMEM (Cout, T)   f32   -- lane-dense output slabs
    """
    a = jnp.dot(wa_ref[...], x1_ref[...], preferred_element_type=jnp.float32)
    oa_ref[...] = jnp.maximum(a + ba_ref[...], 0.0).astype(oa_ref.dtype)

    b = jnp.dot(wb_ref[...], x2_ref[...], preferred_element_type=jnp.float32)
    ob_ref[...] = jnp.maximum(b + bb_ref[...], 0.0).astype(ob_ref.dtype)


def _pick_hw_tile(hw, cin, cout, budget_bytes=24 << 20):
    """Largest lane-aligned (multiple-of-128) tile dividing hw within budget."""
    if hw % 128 != 0:
        return hw  # single full block (legal: block dim == array dim)
    # Per lane-element VMEM: 2 models * (Cin in + Cout out) * 4 B * 2 buffers.
    per_elem = 2 * (cin + cout) * 4 * 2
    cap = max(128, (budget_bytes // per_elem) // 128 * 128)
    if hw <= cap:
        return hw
    t = cap
    while hw % t != 0:
        t -= 128
    return t


def post_fusion_forward(x1, x2, params_a, params_b):
    """Fused forward for both synthetic feature extractors -> (featA, featB)."""
    wa, ba = params_a
    wb, bb = params_b
    n, cin, h, w = x1.shape
    cout = wa.shape[1]
    hw = h * w

    # Contiguous (H, W) -> H*W flatten only; no stacks / transposes.
    x1f = x1.reshape(n, cin, hw)
    x2f = x2.reshape(n, cin, hw)

    wa_t = wa.T.astype(jnp.float32)            # (Cout, Cin)  -- tiny
    wb_t = wb.T.astype(jnp.float32)
    ba_c = ba.reshape(cout, 1).astype(jnp.float32)
    bb_c = bb.reshape(cout, 1).astype(jnp.float32)

    t_hw = _pick_hw_tile(hw, cin, cout)
    grid = (n, hw // t_hw)

    def _const_spec(shape):
        # Tiny parameter blocks: whole array, same block every grid step.
        return pl.BlockSpec(shape, lambda nb, t: (0, 0))

    feat_a, feat_b = pl.pallas_call(
        _dual_1x1_relu_kernel,
        out_shape=(jax.ShapeDtypeStruct((n, cout, hw), jnp.float32),
                   jax.ShapeDtypeStruct((n, cout, hw), jnp.float32)),
        grid=grid,
        in_specs=[
            _const_spec((cout, cin)),                                   # W_A^T
            _const_spec((cout, 1)),                                     # b_A
            _const_spec((cout, cin)),                                   # W_B^T
            _const_spec((cout, 1)),                                     # b_B
            pl.BlockSpec((None, cin, t_hw), lambda nb, t: (nb, 0, t)),  # x1
            pl.BlockSpec((None, cin, t_hw), lambda nb, t: (nb, 0, t)),  # x2
        ],
        out_specs=[
            pl.BlockSpec((None, cout, t_hw), lambda nb, t: (nb, 0, t)),
            pl.BlockSpec((None, cout, t_hw), lambda nb, t: (nb, 0, t)),
        ],
        compiler_params=pltpu.CompilerParams(
            dimension_semantics=("parallel", "parallel"),
            vmem_limit_bytes=48 << 20),
    )(wa_t, ba_c, wb_t, bb_c, x1f, x2f)

    return feat_a.reshape(n, cout, h, w), feat_b.reshape(n, cout, h, w)


class PostFusionModelPallas:
    """JAX/Pallas port of PostFusionModel: runs two feature models, returns a list."""

    def __init__(self, paramsA, paramsB, num_classes):
        self.paramsA = paramsA   # (weight, bias) for featuresA
        self.paramsB = paramsB   # (weight, bias) for featuresB
        self.num_classes = num_classes

    def __call__(self, x1, y1, x2, y2):
        images1, images2 = (x1, x2)
        targets1, targets2 = (y1, y2)
        # MaskRCNN targets only affect the loss path; unused in the forward.
        del targets1, targets2
        featA, featB = post_fusion_forward(
            images1, images2, self.paramsA, self.paramsB)
        resultlist = [featA, featB]
        return resultlist


if __name__ == "__main__":
    key = jax.random.PRNGKey(0)
    kx1, kx2, kwa, kba, kwb, kbb = jax.random.split(key, 6)

    # Small shapes: batch=2, channels=4, spatial=16x16, feature channels=8.
    N, CIN, H, W = 2, 4, 16, 16
    COUT = 8
    NUM_CLASSES = 3

    x1 = jax.random.normal(kx1, (N, CIN, H, W), dtype=jnp.float32)
    x2 = jax.random.normal(kx2, (N, CIN, H, W), dtype=jnp.float32)
    # Synthetic "targets" (class labels); unused by the feature path.
    y1 = jnp.zeros((N,), dtype=jnp.int32)
    y2 = jnp.ones((N,), dtype=jnp.int32)

    wa = jax.random.normal(kwa, (CIN, COUT), dtype=jnp.float32) * 0.1
    ba = jax.random.normal(kba, (COUT,), dtype=jnp.float32) * 0.1
    wb = jax.random.normal(kwb, (CIN, COUT), dtype=jnp.float32) * 0.1
    bb = jax.random.normal(kbb, (COUT,), dtype=jnp.float32) * 0.1

    model = PostFusionModelPallas((wa, ba), (wb, bb), NUM_CLASSES)
    result = model(x1, y1, x2, y2)
    result = jax.block_until_ready(result)

    # Sanity-check against a plain-JAX reference (NCHW 1x1 conv + bias + ReLU).
    def ref(x, w, b):
        out = jnp.einsum("nchw,cf->nfhw", x, w) + b[None, :, None, None]
        return jnp.maximum(out, 0.0)

    assert result[0].shape == (N, COUT, H, W)
    assert result[1].shape == (N, COUT, H, W)
    assert jnp.allclose(result[0], ref(x1, wa, ba), atol=1e-5)
    assert jnp.allclose(result[1], ref(x2, wb, bb), atol=1e-5)

    print("KERNEL_OK")
</pallas_src>

<mosaic_0001>
module attributes {stable_mosaic.version = 11 : i64} {
  func.func @_dual_1x1_relu_kernel(%arg0: i32, %arg1: i32, %arg2: memref<8x4xf32, #tpu.memory_space<vmem>>, %arg3: memref<8x1xf32, #tpu.memory_space<vmem>>, %arg4: memref<8x4xf32, #tpu.memory_space<vmem>>, %arg5: memref<8x1xf32, #tpu.memory_space<vmem>>, %arg6: memref<1x4x256xf32, #tpu.memory_space<vmem>>, %arg7: memref<1x4x256xf32, #tpu.memory_space<vmem>>, %arg8: memref<1x8x256xf32, #tpu.memory_space<vmem>>, %arg9: memref<1x8x256xf32, #tpu.memory_space<vmem>>) attributes {dimension_semantics = [#tpu.dimension_semantics<parallel>, #tpu.dimension_semantics<parallel>], iteration_bounds = array<i64: 2, 1>, scalar_prefetch = 0 : i64, scratch_operands = 0 : i64, tpu.core_type = #tpu.core_type<tc>, window_params = [{pipeline_mode = #tpu.pipeline_mode<synchronous>, transform_indices = @transform_0, window_bounds = array<i64: 8, 4>}, {pipeline_mode = #tpu.pipeline_mode<synchronous>, transform_indices = @transform_1, window_bounds = array<i64: 8, 1>}, {pipeline_mode = #tpu.pipeline_mode<synchronous>, transform_indices = @transform_2, window_bounds = array<i64: 8, 4>}, {pipeline_mode = #tpu.pipeline_mode<synchronous>, transform_indices = @transform_3, window_bounds = array<i64: 8, 1>}, {transform_indices = @transform_4, window_bounds = array<i64: 1, 4, 256>}, {transform_indices = @transform_5, window_bounds = array<i64: 1, 4, 256>}, {transform_indices = @transform_6, window_bounds = array<i64: 1, 8, 256>}, {transform_indices = @transform_7, window_bounds = array<i64: 1, 8, 256>}]} {
    %c0 = arith.constant 0 : index
    %c0_0 = arith.constant 0 : index
    %0 = vector.load %arg2[%c0, %c0_0] : memref<8x4xf32, #tpu.memory_space<vmem>>, vector<8x4xf32>
    %c0_1 = arith.constant 0 : index
    %c0_2 = arith.constant 0 : index
    %c0_3 = arith.constant 0 : index
    %1 = vector.load %arg6[%c0_1, %c0_2, %c0_3] : memref<1x4x256xf32, #tpu.memory_space<vmem>>, vector<1x4x256xf32>
    %2 = vector.shape_cast %1 : vector<1x4x256xf32> to vector<4x256xf32>
    %cst = arith.constant dense<0.000000e+00> : vector<8x256xf32>
    %3 = tpu.matmul %0, %2, %cst {dimension_numbers = #tpu.dot_dimension_numbers<[1], [0], [0], [1], [0, 0, 1, 1], [], []>} : vector<8x4xf32>, vector<4x256xf32>, vector<8x256xf32> -> vector<8x256xf32>
    %c0_4 = arith.constant 0 : index
    %c0_5 = arith.constant 0 : index
    %4 = vector.load %arg3[%c0_4, %c0_5] : memref<8x1xf32, #tpu.memory_space<vmem>>, vector<8x1xf32>
    %5 = vector.broadcast %4 : vector<8x1xf32> to vector<8x256xf32>
    %6 = arith.addf %3, %5 : vector<8x256xf32>
    %cst_6 = arith.constant 0.000000e+00 : f32
    %7 = vector.broadcast %cst_6 : f32 to vector<8x256xf32>
    %8 = arith.maximumf %6, %7 : vector<8x256xf32>
    %c0_7 = arith.constant 0 : index
    %c0_8 = arith.constant 0 : index
    %c0_9 = arith.constant 0 : index
    %9 = vector.load %arg8[%c0_7, %c0_8, %c0_9] : memref<1x8x256xf32, #tpu.memory_space<vmem>>, vector<1x8x256xf32>
    %10 = vector.shape_cast %9 : vector<1x8x256xf32> to vector<8x256xf32>
    %11 = vector.shape_cast %8 : vector<8x256xf32> to vector<1x8x256xf32>
    tpu.vector_store %arg8[%c0_7, %c0_8, %c0_9], %11 {strides = array<i32>} : memref<1x8x256xf32, #tpu.memory_space<vmem>>, vector<1x8x256xf32>,
    %c0_10 = arith.constant 0 : index
    %c0_11 = arith.constant 0 : index
    %12 = vector.load %arg4[%c0_10, %c0_11] : memref<8x4xf32, #tpu.memory_space<vmem>>, vector<8x4xf32>
    %c0_12 = arith.constant 0 : index
    %c0_13 = arith.constant 0 : index
    %c0_14 = arith.constant 0 : index
    %13 = vector.load %arg7[%c0_12, %c0_13, %c0_14] : memref<1x4x256xf32, #tpu.memory_space<vmem>>, vector<1x4x256xf32>
    %14 = vector.shape_cast %13 : vector<1x4x256xf32> to vector<4x256xf32>
    %cst_15 = arith.constant dense<0.000000e+00> : vector<8x256xf32>
    %15 = tpu.matmul %12, %14, %cst_15 {dimension_numbers = #tpu.dot_dimension_numbers<[1], [0], [0], [1], [0, 0, 1, 1], [], []>} : vector<8x4xf32>, vector<4x256xf32>, vector<8x256xf32> -> vector<8x256xf32>
    %c0_16 = arith.constant 0 : index
    %c0_17 = arith.constant 0 : index
    %16 = vector.load %arg5[%c0_16, %c0_17] : memref<8x1xf32, #tpu.memory_space<vmem>>, vector<8x1xf32>
    %17 = vector.broadcast %16 : vector<8x1xf32> to vector<8x256xf32>
    %18 = arith.addf %15, %17 : vector<8x256xf32>
    %cst_18 = arith.constant 0.000000e+00 : f32
    %19 = vector.broadcast %cst_18 : f32 to vector<8x256xf32>
    %20 = arith.maximumf %18, %19 : vector<8x256xf32>
    %c0_19 = arith.constant 0 : index
    %c0_20 = arith.constant 0 : index
    %c0_21 = arith.constant 0 : index
    %21 = vector.load %arg9[%c0_19, %c0_20, %c0_21] : memref<1x8x256xf32, #tpu.memory_space<vmem>>, vector<1x8x256xf32>
    %22 = vector.shape_cast %21 : vector<1x8x256xf32> to vector<8x256xf32>
    %23 = vector.shape_cast %20 : vector<8x256xf32> to vector<1x8x256xf32>
    tpu.vector_store %arg9[%c0_19, %c0_20, %c0_21], %23 {strides = array<i32>} : memref<1x8x256xf32, #tpu.memory_space<vmem>>, vector<1x8x256xf32>,
    return
  }
  func.func @transform_0(%arg0: i32, %arg1: i32) -> (i32, i32) {
    %c0_i32 = arith.constant 0 : i32
    %c0_i32_0 = arith.constant 0 : i32
    %c0_i32_1 = arith.constant 0 : i32
    return %c0_i32, %c0_i32_0 : i32, i32
  }
  func.func @transform_1(%arg0: i32, %arg1: i32) -> (i32, i32) {
    %c0_i32 = arith.constant 0 : i32
    %c0_i32_0 = arith.constant 0 : i32
    %c0_i32_1 = arith.constant 0 : i32
    return %c0_i32, %c0_i32_0 : i32, i32
  }
  func.func @transform_2(%arg0: i32, %arg1: i32) -> (i32, i32) {
    %c0_i32 = arith.constant 0 : i32
    %c0_i32_0 = arith.constant 0 : i32
    %c0_i32_1 = arith.constant 0 : i32
    return %c0_i32, %c0_i32_0 : i32, i32
  }
  func.func @transform_3(%arg0: i32, %arg1: i32) -> (i32, i32) {
    %c0_i32 = arith.constant 0 : i32
    %c0_i32_0 = arith.constant 0 : i32
    %c0_i32_1 = arith.constant 0 : i32
    return %c0_i32, %c0_i32_0 : i32, i32
  }
  func.func @transform_4(%arg0: i32, %arg1: i32) -> (i32, i32, i32) {
    %c0_i32 = arith.constant 0 : i32
    %c0_i32_0 = arith.constant 0 : i32
    return %arg0, %c0_i32, %arg1 : i32, i32, i32
  }
  func.func @transform_5(%arg0: i32, %arg1: i32) -> (i32, i32, i32) {
    %c0_i32 = arith.constant 0 : i32
    %c0_i32_0 = arith.constant 0 : i32
    return %arg0, %c0_i32, %arg1 : i32, i32, i32
  }
  func.func @transform_6(%arg0: i32, %arg1: i32) -> (i32, i32, i32) {
    %c0_i32 = arith.constant 0 : i32
    %c0_i32_0 = arith.constant 0 : i32
    return %arg0, %c0_i32, %arg1 : i32, i32, i32
  }
  func.func @transform_7(%arg0: i32, %arg1: i32) -> (i32, i32, i32) {
    %c0_i32 = arith.constant 0 : i32
    %c0_i32_0 = arith.constant 0 : i32
    return %arg0, %c0_i32, %arg1 : i32, i32, i32
  }
}

</mosaic_0001>

<bundles_post_ra>
// kernel: tpu_custom_call.1
= control target key start
LH: loop header
LB: loop body
LE: loop exit
PB: predicated region body
PF: predicated region fallthrough
CT: control target
= control target key end

     0   :  { %s1115_s0 = inlined_call_operand.vmem [shape: f32[8,4], index: 0, kind: input, shape index: {}]   ;;  %s1116_s1 = inlined_call_operand.vmem [shape: f32[8,1], index: 1, kind: input, shape index: {}]   ;;  %s1117_s2 = inlined_call_operand.vmem [shape: f32[8,4], index: 2, kind: input, shape index: {}]   ;;  %s1118_s3 = inlined_call_operand.vmem [shape: f32[8,1], index: 3, kind: input, shape index: {}]   ;;  %s1119_s4 = inlined_call_operand.vmem [shape: f32[2,4,256], index: 4, kind: input, shape index: {}]   ;;  %s1120_s5 = inlined_call_operand.vmem [shape: f32[2,4,256], index: 5, kind: input, shape index: {}]   ;;  %s1121_s6 = inlined_call_operand.hbm [shape: f32[2,8,256], index: 6, kind: output, shape index: {0}]   ;;  %s1122_s7 = inlined_call_operand.hbm [shape: f32[2,8,256], index: 7, kind: output, shape index: {1}]  }
   0x1   :  { %1123 = sst [smem:[#allocation8_spill]] %s1115_s0 }
   0x2   :  { %13 = vsyncpa [#allocation3], 0 }
   0x3   :  { %15 = vsyncpa [#allocation3 + $0x1], 0 }
   0x4   :  { %16 = vsyncpa [#allocation5], 0 }
   0x5   :  { %18 = vsyncpa [#allocation5 + $0x1], 0  ;;  %s957_s24 = smov 0   ;;  %s959_s25 = smov 0  }
   0x6   :  { %s961_s26 = smov 0   ;;  %s963_s27 = smov 0  }
   0x7   :  { %s965_s28 = smov 0   ;;  %s967_s29 = smov 0  }
   0x8 LB: > { %s711_s30 = sadd.s32 4294967295, %s911_s29   ;;  %s712_s8 = sadd.s32 4294967294, %s911_s29   ;;  %s911_s29 = sphi %s967_s29, %s24_s29   ;;  %s907_s28 = sphi %s965_s28, %s1131_s28   ;;  %s903_s27 = sphi %s963_s27, %s1130_s27   ;;  %s899_s26 = sphi %s961_s26, %s1129_s26   ;;  %s895_s25 = sphi %s959_s25, %s1128_s25   ;;  %s891_s24 = sphi %s957_s24, %s1127_s24  }
   0x9   : > { %s36_s9 = sadd.s32 1, %s907_s28  ;;  %s185_s10 = sadd.s32 1, %s899_s26 }
   0xa   : > { %p38_p0 = scmp.ge.s32.totalorder %s36_s9, 2  ;;  %p195_p1 = scmp.ne.s32.totalorder %s899_s26, %s895_s25 }
   0xb   : > { %p196_p2 = scmp.eq.s32.totalorder %s711_s30, 1  ;;  %p201_p3 = scmp.ne.s32.totalorder %s895_s25, %s891_s24 }
   0xc   : > { %s1133_s9 = smov (%p38_p0, %s36_s9), 0  ;;  %p202_p5 = scmp.eq.s32.totalorder %s712_s8, 1 }
   0xd   : > { %p997_p4 = por %p196_p2, %p195_p1  ;;  %s180_s12 = ssub.s32 %s907_s28, %s1133_s9 }
   0xe   : > { %p715_p6 = scmp.ge.s32.totalorder %s911_s29, 1  ;;  %p183_p7 = scmp.eq.s32.totalorder %s180_s12, 0 }
   0xf   : > { %p1004_p8 = por %p202_p5, %p201_p3  ;;  %p286_p9 = scmp.lt.s32.totalorder %s911_s29, 3 }
  0x10   : > { %s1010_s14 = scalar_select %p183_p7, %s899_s26, %s185_s10  }
  0x11   : > { %p287_p10 = pnand %p715_p6, %p286_p9 }
  0x12   : > { %p337_p11 = scmp.lt.s32.totalorder (!%p287_p10), %s903_s27, 1  ;;  %s1126_s0 = sld [smem:[#allocation8_spill]] (!%p287_p10) }
  0x13   : > { %290 = sbr.rel (%p287_p10) target bundleno = 268 (0x10c), region = 44  ;;  %s738_s20 = sshll.u32 (!%p287_p10), %s903_s27, 8 }
  0x14   : > { %s1040_s12 = scalar_lea.hbm (!%p287_p10), %s1121_s6, %s738_s20  ;;  %s1047_s16 = scalar_lea.hbm (!%p287_p10), %s1122_s7, %s738_s20 }
  0x15   : > { %s915_s8 = smov (!%p287_p10), [#allocation2]  }
  0x18   : > { %v913_v0 = vmov 0.0   ;;  %v360_v1 = vld [vmem:[%s1116_s1] sm:$0xff]  ;;  %s338_s17 = scalar_select %p337_p11, %s903_s27, 1  ;;  %v914_v2 = vmov 0   ;;  %vm372_vm0 = vcmask 1043456   ;;  %vm368_vm1 = vcmask 31744  }
  0x19   : > { %441 = vmatprep.mubr.f32.mxu0 %v913_v0  ;;  %533 = vmatprep.mubr.f32.mxu1 %v913_v0  ;;  %v454_v3 = vld [vmem:[%s1118_s3] sm:$0xff] }
  0x1a   : > { %802 = vset.pattern.permute.xlu0 %v914_v2  ;;  %s736_s18 = sshll.u32 %s338_s17, 3  ;;  %v358_v8 = vld [vmem:[%s1126_s0] sm:$0xff] }
  0x1b   : > { %363 = vperm.xlu0 %802, %v360_v1   ;;  %s344_s23 = scalar_lea.vmem %s1119_s4, %s736_s18  ;;  %s354_s10 = scalar_lea.vmem %s1120_s5, %s736_s18  ;;  %v452_v9 = vld [vmem:[%s1117_s2] sm:$0xff] }
  0x1c   : > { %v359_v4 = vld [vmem:[%s344_s23] sm:$0xff]  ;;  %s1033_s18 = sand.u32 1, %s895_s25  }
  0x1d   : > { %v453_v5 = vld [vmem:[%s354_s10] sm:$0xff]  ;;  %v367_v6 = vcombine.high %v359_v4, %v359_v4  ;;  %s716_s19 = sshll.u32 %s1033_s18, 4  ;;  %s545_s17 = scalar_lea.sflag [#allocation3], %s1033_s18 }
  0x1e   : > { %v461_v7 = vcombine.high %v453_v5, %v453_v5  ;;  %s328_s21 = scalar_lea.vmem [#allocation2], %s716_s19  ;;  %s335_s23 = scalar_lea.vmem [#allocation4], %s716_s19 }
  0x1f   : > { %457 = vperm.xlu0 %802, %v454_v3   ;;  %722 = vmatprep.subr.msk.mxu0 %vm372_vm0, %v367_v6  ;;  %s566_s22 = sshll.u32 %s328_s21, 4  ;;  %s582_s30 = sshll.u32 %s335_s23, 4  ;;  %s1042_s22 = int_to_ptr.vmem [resolvable:$true] %s566_s22  ;;  %s1049_s30 = int_to_ptr.vmem [resolvable:$true] %s582_s30 }
  0x20   : > { %725 = vmatprep.subr.msk.mxu1 %vm372_vm0, %v461_v7  ;;  %723 = vmatpush1.msk.msra.mxu0 %vm372_vm0, %v359_v4  ;;  %s805_s19 = scalar_lea.vmem %s1042_s22, 256  ;;  %s809_s10 = sshll.u32 %s915_s8, 4  ;;  %s810_s10 = int_to_ptr.vmem [resolvable:$false] %s809_s10 }
  0x21   : > { %726 = vmatpush1.msk.msra.mxu1 %vm372_vm0, %v453_v5  ;;  %724 = vmatmul.mubr.msk.f32.vlgmr.msra.gmra.mxu0 %vm368_vm1, %v358_v8  ;;  %p806_p12 = scmp.ne.s32.totalorder %s1042_s22, %s805_s19  ;;  %s811_s0 = scalar_lea.vmem %s810_s10, 512 }
  0x22   : > { %727 = vmatmul.mubr.msk.f32.vlgmr.msra.gmra.mxu1 %vm368_vm1, %v452_v9  ;;  %p812_p1 = scmp.lt.s32.totalorder %s1042_s22, %s810_s10  ;;  %p813_p2 = scmp.lt.s32.totalorder %s811_s0, %s805_s19 }
  0x23   : > { %p807_p13 = pnand %p806_p12, %p997_p4 }
  0x24   : > { %p814_p3 = por %p813_p2, %p812_p1 }
  0x25   : > { %p808_p0 = pneg %p807_p13 }
  0x27   : > { %p815_p5 = pnand %p814_p3, %p808_p0 }
  0x96   : > { %v364_v10 = vpop.permute.xlu0 %363 }
  0x9a   : > { %v458_v11 = vpop.permute.xlu0 %457 }
  0xe1   : > { %v443_v12 = vpop.f32.mrf.mxu0 }
  0xe2   : > { %v535_v13 = vpop.f32.mrf.mxu1  ;;  %v444_v14 = vadd.f32 %v443_v12, %v364_v10 }
  0xe3   : > { %v536_v15 = vadd.f32 %v535_v13, %v458_v11  ;;  %v445_v16 = vpop.f32.mrf.mxu0 }
  0xe4   : > { %v537_v17 = vpop.f32.mrf.mxu1  ;;  %v448_v18 = vmax.f32 %v444_v14, 0.0  ;;  %v446_v20 = vadd.f32 %v445_v16, %v364_v10 }
  0xe5   : > { %v540_v19 = vmax.f32 %v536_v15, 0.0  ;;  %v538_v21 = vadd.f32 %v537_v17, %v458_v11 }
  0xe6   : > { %450 = vst [vmem:[%s328_s21] sm:$0xff] %v448_v18  ;;  %v449_v22 = vmax.f32 %v446_v20, 0.0 }
  0xe7   : > { %542 = vst [vmem:[%s335_s23] sm:$0xff] %v540_v19  ;;  %v541_v23 = vmax.f32 %v538_v21, 0.0 }
  0xe8   : > { %451 = vst [vmem:[%s328_s21 + $0x8] sm:$0xff] %v449_v22 }
  0xe9   : > { %543 = vst [vmem:[%s335_s23 + $0x8] sm:$0xff] %v541_v23 }
  0xea   : > { %818 = shalt.err (!%p815_p5)
}
  0xeb   : > { %s819_s20 = scalar_lea.hbm %s1040_s12, 256  ;;  %s823_s27 = scalar_lea.hbm %s1121_s6, 512 }
  0xec   : > { %p820_p6 = scmp.ne.s32.totalorder %s1040_s12, %s819_s20  ;;  %p824_p10 = scmp.lt.s32.totalorder %s1040_s12, %s1121_s6 }
  0xed   : > { %p825_p11 = scmp.lt.s32.totalorder %s823_s27, %s819_s20 }
  0xee   : > { %p821_p7 = pnand %p820_p6, %p997_p4 }
  0xef   : > { %p826_p12 = por %p825_p11, %p824_p10 }
  0xf0   : > { %p822_p9 = pneg %p821_p7 }
  0xf2   : > { %p827_p13 = pnand %p826_p12, %p822_p9 }
  0xf4   : > { %830 = shalt.err (!%p827_p13)
}
  0xf5   : > { %740 = dma.vmem_to_hbm [thread:$0]  (%p997_p4), %s1042_s22, 256, %s1040_s12, %s545_s17  }
  0xf6   : > { %s550_s0 = scalar_lea.sflag [#allocation5], %s1033_s18  ;;  %s831_s19 = scalar_lea.vmem %s1049_s30, 256 }
  0xf7   : > { %p832_p0 = scmp.ne.s32.totalorder %s1049_s30, %s831_s19  ;;  %s916_s10 = smov [#allocation4]  }
  0xf8   : > { %s835_s20 = sshll.u32 %s916_s10, 4  ;;  %s836_s20 = int_to_ptr.vmem [resolvable:$false] %s835_s20 }
  0xf9   : > { %p833_p1 = pnand %p832_p0, %p997_p4  ;;  %s837_s21 = scalar_lea.vmem %s836_s20, 512 }
  0xfa   : > { %p838_p3 = scmp.lt.s32.totalorder %s1049_s30, %s836_s20  ;;  %p839_p5 = scmp.lt.s32.totalorder %s837_s21, %s831_s19 }
  0xfb   : > { %p834_p2 = pneg %p833_p1 }
  0xfc   : > { %p840_p6 = por %p839_p5, %p838_p3 }
  0xfe   : > { %p841_p7 = pnand %p840_p6, %p834_p2 }
 0x100   : > { %844 = shalt.err (!%p841_p7)
}
 0x101   : > { %s845_s22 = scalar_lea.hbm %s1047_s16, 256  ;;  %s849_s17 = scalar_lea.hbm %s1122_s7, 512 }
 0x102   : > { %p846_p9 = scmp.ne.s32.totalorder %s1047_s16, %s845_s22  ;;  %p850_p12 = scmp.lt.s32.totalorder %s1047_s16, %s1122_s7 }
 0x103   : > { %p851_p13 = scmp.lt.s32.totalorder %s849_s17, %s845_s22 }
 0x104   : > { %p847_p10 = pnand %p846_p9, %p997_p4 }
 0x105   : > { %p852_p0 = por %p851_p13, %p850_p12 }
 0x106   : > { %p848_p11 = pneg %p847_p10 }
 0x108   : > { %p853_p1 = pnand %p852_p0, %p848_p11 }
 0x10a   : > { %856 = shalt.err (!%p853_p1)
}
 0x10b   : > { %741 = dma.vmem_to_hbm [thread:$0]  (%p997_p4), %s1049_s30, 256, %s1047_s16, %s550_s0  }
 0x10c PF: > { %p751_p2 = scmp.ge.s32.totalorder %s911_s29, 2  ;;  %s594_s15 = sand.u32 1, %s891_s24  }
 0x10d   : > { %s595_s8 = scalar_lea.sflag [#allocation3], %s594_s15 }
 0x10e   : > { %p745_p3 = pnand %p751_p2, %p1004_p8 }
 0x110   : > { %p746_p5 = pneg %p745_p3 }
 0x112   : > { %882 = dma.done.wait (%p746_p5), %s595_s8, 256  }
 0x113   : > { %884 = vsyncadd (%p746_p5), %s595_s8, 4294967040  ;;  %s604_s19 = scalar_lea.sflag [#allocation5], %s594_s15 }
 0x114   : > { %886 = dma.done.wait (%p746_p5), %s604_s19, 256  }
 0x115   : > { %888 = vsyncadd (%p746_p5), %s604_s19, 4294967040  ;;  %s24_s29 = sadd.s32 1, %s911_s29   ;;  %s1127_s24 = smov %s895_s25 }
 0x116   : > { %p21_p6 = scmp.ge.s32.totalorder %s24_s29, 4   ;;  %s1128_s25 = smov %s899_s26 }
 0x117   : > { %s1129_s26 = smov %s1010_s14  ;;  %s1130_s27 = smov %s907_s28 }
 0x118   : > { %s1131_s28 = smov %s1133_s9  ;;  %23 = sbr.rel (!%p21_p6) target bundleno = 8 (0x8), region = 99 }
 0x11d   :  { %609 = vsyncpa [#allocation3], 1 }
 0x11e   :  { %611 = vsyncpa [#allocation3 + $0x1], 1 }
 0x11f   :  { %612 = vsyncpa [#allocation5], 1 }
 0x120   :  { %614 = vsyncpa [#allocation5 + $0x1], 1 }

</bundles_post_ra>
